<compile_context>
chip_gen: v7x
topology: tpu7x:2x2x1
jax: 0.10.0
libtpu: 0.0.40
codegen_flags: <defaults>
</compile_context>

<pallas_src>
import jax
import jax.numpy as jnp
from jax.experimental import pallas as pl
from jax.experimental.pallas import tpu as pltpu


def _make_kernel(use_einshape):
    def kernel(x_ref, o_ref):
        # x_ref: (B, C, H, W)   o_ref: (2, B, 3, C*W)   with B == H
        B, C, H, W = x_ref.shape
        x = x_ref[...]

        # `return 2.0 * x6` from the module is folded into the reduced values;
        # both reductions accumulate in float32.
        # channels [0, C)   of x5: sum over H of the x1 block   -> s1 (B, C, W)
        # channels [C, 3C)  of x5: sum over B of the x2 blocks  -> s2 (H, C, W), twice
        s1 = 2.0 * jnp.sum(x, axis=2, dtype=jnp.float32)       # (B, C, W)
        s2_chw = 2.0 * jnp.sum(x, axis=0, dtype=jnp.float32)   # (C, H, W)

        if use_einshape:
            # Single layout-aware permute (XLU slot; free relative to VPU/store path).
            s2 = pltpu.einshape("chw->hcw", s2_chw)             # (H, C, W) == (B, C, W)
        else:
            # TODO(synk): fallback only (O(H) unrolled sublane copies); the
            # einshape path above is preferred and is tried first.
            s2 = jnp.stack([s2_chw[:, h, :] for h in range(H)], axis=0)

        # Channel-cat coalesced into one row via a major-dim stack (cheap: no
        # lane/sublane movement), then flattened to a lane-dense slab.
        row = jnp.stack([s1, s2, s2], axis=1)                   # (B, 3, C, W)
        row = row.reshape(B, 3, C * W).astype(o_ref.dtype)      # lane-dense

        # x6 = cat((x5, x5), dim=0): pure duplication -> two full-block stores.
        o_ref[0] = row
        o_ref[1] = row

    return kernel


def model_forward(x):
    B, C, H, W = x.shape
    assert B == H, "fixed-up forward requires B == H (see module notes)"

    out_shape = jax.ShapeDtypeStruct((2, B, 3, C * W), x.dtype)

    def _call(use_einshape):
        return pl.pallas_call(
            _make_kernel(use_einshape),
            out_shape=out_shape,
            in_specs=[pl.BlockSpec(memory_space=pltpu.MemorySpace.VMEM)],
            out_specs=pl.BlockSpec(memory_space=pltpu.MemorySpace.VMEM),
            # TODO(synk): for non-toy shapes add grid=(C // tile_c,), blocked
            # in/out specs, dimension_semantics=("parallel",) and
            # vmem_limit_bytes via pltpu.CompilerParams.
        )(x)

    try:
        out5 = _call(True)      # preferred: pltpu.einshape permute
    except Exception:           # lowering safety net only
        out5 = _call(False)     # slice+stack permute fallback

    # Free wrapper-side logical reshapes on the tiny output:
    # (2, B, 3, C*W) -> (2B, 3C, W), plus the trailing singleton carried from
    # x.view(x.shape + (1,)) through sum/cat.
    return out5.reshape(2 * B, 3 * C, W)[..., None]


def _reference(x):
    # Pure-JAX reference of the same (fixed-up) semantics, incl. the 2.0 * x6.
    x1 = x[..., None]                                  # (B, C, H, W, 1)
    x2 = jnp.swapaxes(x1, 0, 2)                        # (H, C, B, W, 1)
    x4 = jnp.concatenate([x1, x2, x2], axis=1)         # (B, 3C, H, W, 1), needs B == H
    x5 = jnp.sum(x4, axis=2)                           # (B, 3C, W, 1)
    x6 = jnp.concatenate([x5, x5], axis=0)             # (2B, 3C, W, 1)
    return 2.0 * x6


if __name__ == "__main__":
    key = jax.random.PRNGKey(0)
    k1, k2 = jax.random.split(key)

    # Canonical module input (B, C, H, W) = (2, 3, 2, 2); fixed-up semantics need B == H.
    x_small = jax.random.normal(k1, (2, 3, 2, 2), dtype=jnp.float32)
    out = jax.block_until_ready(model_forward(x_small))
    ref = _reference(x_small)
    assert out.shape == ref.shape == (4, 9, 2, 1), (out.shape, ref.shape)
    assert jnp.allclose(out, ref, atol=1e-5, rtol=1e-5)

    # A slightly larger (still small) shape to exercise the lane-dense path.
    x_big = jax.random.normal(k2, (8, 4, 8, 16), dtype=jnp.float32)
    out_b = jax.block_until_ready(model_forward(x_big))
    ref_b = _reference(x_big)
    assert out_b.shape == ref_b.shape == (16, 12, 16, 1), (out_b.shape, ref_b.shape)
    assert jnp.allclose(out_b, ref_b, atol=1e-4, rtol=1e-5)

    print("KERNEL_OK")
</pallas_src>

<mosaic_0001>
module attributes {stable_mosaic.version = 11 : i64} {
  func.func @kernel(%arg0: memref<2x3x2x2xf32, #tpu.memory_space<vmem>>, %arg1: memref<2x2x3x6xf32, #tpu.memory_space<vmem>>) attributes {dimension_semantics = [], scalar_prefetch = 0 : i64, scratch_operands = 0 : i64, tpu.core_type = #tpu.core_type<tc>} {
    %c0 = arith.constant 0 : index
    %c0_0 = arith.constant 0 : index
    %c0_1 = arith.constant 0 : index
    %c0_2 = arith.constant 0 : index
    %0 = vector.load %arg0[%c0, %c0_0, %c0_1, %c0_2] : memref<2x3x2x2xf32, #tpu.memory_space<vmem>>, vector<2x3x2x2xf32>
    %cst = arith.constant dense<0.000000e+00> : vector<2x3x2xf32>
    %1 = vector.multi_reduction <add>, %0, %cst [2] : vector<2x3x2x2xf32> to vector<2x3x2xf32>
    %cst_3 = arith.constant 2.000000e+00 : f32
    %2 = vector.broadcast %cst_3 : f32 to vector<2x3x2xf32>
    %3 = arith.mulf %2, %1 : vector<2x3x2xf32>
    %cst_4 = arith.constant dense<0.000000e+00> : vector<3x2x2xf32>
    %4 = vector.multi_reduction <add>, %0, %cst_4 [0] : vector<2x3x2x2xf32> to vector<3x2x2xf32>
    %cst_5 = arith.constant 2.000000e+00 : f32
    %5 = vector.broadcast %cst_5 : f32 to vector<3x2x2xf32>
    %6 = arith.mulf %5, %4 : vector<3x2x2xf32>
    %7 = tpu.transpose %6, [1, 0, 2] : vector<3x2x2xf32> -> vector<2x3x2xf32>
    %8 = vector.shape_cast %3 : vector<2x3x2xf32> to vector<2x1x3x2xf32>
    %9 = vector.shape_cast %7 : vector<2x3x2xf32> to vector<2x1x3x2xf32>
    %10 = vector.shape_cast %7 : vector<2x3x2xf32> to vector<2x1x3x2xf32>
    %11 = tpu.concatenate %8, %9, %10 in 1 : vector<2x1x3x2xf32>, vector<2x1x3x2xf32>, vector<2x1x3x2xf32> -> vector<2x3x3x2xf32>
    %12 = vector.shape_cast %11 : vector<2x3x3x2xf32> to vector<2x3x6xf32>
    %c0_6 = arith.constant 0 : index
    %c0_7 = arith.constant 0 : index
    %c0_8 = arith.constant 0 : index
    %c0_9 = arith.constant 0 : index
    %13 = vector.load %arg1[%c0_6, %c0_7, %c0_8, %c0_9] : memref<2x2x3x6xf32, #tpu.memory_space<vmem>>, vector<1x2x3x6xf32>
    %14 = vector.shape_cast %13 : vector<1x2x3x6xf32> to vector<2x3x6xf32>
    %15 = vector.shape_cast %12 : vector<2x3x6xf32> to vector<1x2x3x6xf32>
    tpu.vector_store %arg1[%c0_6, %c0_7, %c0_8, %c0_9], %15 {strides = array<i32>} : memref<2x2x3x6xf32, #tpu.memory_space<vmem>>, vector<1x2x3x6xf32>,
    %c1 = arith.constant 1 : index
    %c0_10 = arith.constant 0 : index
    %c0_11 = arith.constant 0 : index
    %c0_12 = arith.constant 0 : index
    %16 = vector.load %arg1[%c1, %c0_10, %c0_11, %c0_12] : memref<2x2x3x6xf32, #tpu.memory_space<vmem>>, vector<1x2x3x6xf32>
    %17 = vector.shape_cast %16 : vector<1x2x3x6xf32> to vector<2x3x6xf32>
    %18 = vector.shape_cast %12 : vector<2x3x6xf32> to vector<1x2x3x6xf32>
    tpu.vector_store %arg1[%c1, %c0_10, %c0_11, %c0_12], %18 {strides = array<i32>} : memref<2x2x3x6xf32, #tpu.memory_space<vmem>>, vector<1x2x3x6xf32>,
    return
  }
}

module attributes {stable_mosaic.version = 11 : i64} {
  func.func @kernel(%arg0: memref<2x3x2x2xf32, #tpu.memory_space<vmem>>, %arg1: memref<2x2x3x6xf32, #tpu.memory_space<vmem>>) attributes {dimension_semantics = [], scalar_prefetch = 0 : i64, scratch_operands = 0 : i64, tpu.core_type = #tpu.core_type<tc>} {
    %c0 = arith.constant 0 : index
    %c0_0 = arith.constant 0 : index
    %c0_1 = arith.constant 0 : index
    %c0_2 = arith.constant 0 : index
    %0 = vector.load %arg0[%c0, %c0_0, %c0_1, %c0_2] : memref<2x3x2x2xf32, #tpu.memory_space<vmem>>, vector<2x3x2x2xf32>
    %cst = arith.constant dense<0.000000e+00> : vector<2x3x2xf32>
    %1 = vector.multi_reduction <add>, %0, %cst [2] : vector<2x3x2x2xf32> to vector<2x3x2xf32>
    %cst_3 = arith.constant 2.000000e+00 : f32
    %2 = vector.broadcast %cst_3 : f32 to vector<2x3x2xf32>
    %3 = arith.mulf %2, %1 : vector<2x3x2xf32>
    %cst_4 = arith.constant dense<0.000000e+00> : vector<3x2x2xf32>
    %4 = vector.multi_reduction <add>, %0, %cst_4 [0] : vector<2x3x2x2xf32> to vector<3x2x2xf32>
    %cst_5 = arith.constant 2.000000e+00 : f32
    %5 = vector.broadcast %cst_5 : f32 to vector<3x2x2xf32>
    %6 = arith.mulf %5, %4 : vector<3x2x2xf32>
    %7 = vector.extract_strided_slice %6 {offsets = [0, 0, 0], sizes = [3, 1, 2], strides = [1, 1, 1]} : vector<3x2x2xf32> to vector<3x1x2xf32>
    %8 = vector.shape_cast %7 : vector<3x1x2xf32> to vector<3x2xf32>
    %9 = vector.extract_strided_slice %6 {offsets = [0, 1, 0], sizes = [3, 1, 2], strides = [1, 1, 1]} : vector<3x2x2xf32> to vector<3x1x2xf32>
    %10 = vector.shape_cast %9 : vector<3x1x2xf32> to vector<3x2xf32>
    %11 = vector.shape_cast %8 : vector<3x2xf32> to vector<1x3x2xf32>
    %12 = vector.shape_cast %10 : vector<3x2xf32> to vector<1x3x2xf32>
    %13 = tpu.concatenate %11, %12 in 0 : vector<1x3x2xf32>, vector<1x3x2xf32> -> vector<2x3x2xf32>
    %14 = vector.shape_cast %3 : vector<2x3x2xf32> to vector<2x1x3x2xf32>
    %15 = vector.shape_cast %13 : vector<2x3x2xf32> to vector<2x1x3x2xf32>
    %16 = vector.shape_cast %13 : vector<2x3x2xf32> to vector<2x1x3x2xf32>
    %17 = tpu.concatenate %14, %15, %16 in 1 : vector<2x1x3x2xf32>, vector<2x1x3x2xf32>, vector<2x1x3x2xf32> -> vector<2x3x3x2xf32>
    %18 = vector.shape_cast %17 : vector<2x3x3x2xf32> to vector<2x3x6xf32>
    %c0_6 = arith.constant 0 : index
    %c0_7 = arith.constant 0 : index
    %c0_8 = arith.constant 0 : index
    %c0_9 = arith.constant 0 : index
    %19 = vector.load %arg1[%c0_6, %c0_7, %c0_8, %c0_9] : memref<2x2x3x6xf32, #tpu.memory_space<vmem>>, vector<1x2x3x6xf32>
    %20 = vector.shape_cast %19 : vector<1x2x3x6xf32> to vector<2x3x6xf32>
    %21 = vector.shape_cast %18 : vector<2x3x6xf32> to vector<1x2x3x6xf32>
    tpu.vector_store %arg1[%c0_6, %c0_7, %c0_8, %c0_9], %21 {strides = array<i32>} : memref<2x2x3x6xf32, #tpu.memory_space<vmem>>, vector<1x2x3x6xf32>,
    %c1 = arith.constant 1 : index
    %c0_10 = arith.constant 0 : index
    %c0_11 = arith.constant 0 : index
    %c0_12 = arith.constant 0 : index
    %22 = vector.load %arg1[%c1, %c0_10, %c0_11, %c0_12] : memref<2x2x3x6xf32, #tpu.memory_space<vmem>>, vector<1x2x3x6xf32>
    %23 = vector.shape_cast %22 : vector<1x2x3x6xf32> to vector<2x3x6xf32>
    %24 = vector.shape_cast %18 : vector<2x3x6xf32> to vector<1x2x3x6xf32>
    tpu.vector_store %arg1[%c1, %c0_10, %c0_11, %c0_12], %24 {strides = array<i32>} : memref<2x2x3x6xf32, #tpu.memory_space<vmem>>, vector<1x2x3x6xf32>,
    return
  }
}

</mosaic_0001>

<bundles_post_ra>
// kernel: tpu_custom_call.1
= control target key start
LH: loop header
LB: loop body
LE: loop exit
PB: predicated region body
PF: predicated region fallthrough
CT: control target
= control target key end

     0   :  { %vm14_vm0 = vcmask 9216   ;;  %v227_v3 = vmov 1983009808   ;;  %v72_v8 = vlaneseq  ;;  %v228_v9 = vmov 1934713408   ;;  %s231_s18 = smov 2   ;;  %s278_s0 = inlined_call_operand.vmem [shape: f32[2,3,2,2], index: 0, kind: input, shape index: {}]   ;;  %s279_s1 = inlined_call_operand.vmem [shape: f32[2,2,3,6], index: 1, kind: output, shape index: {}]  }
   0x1   :  { %v8_v0 = vld [vmem:[%s278_s0] sm:$0x3]  ;;  %v9_v1 = vld [vmem:[%s278_s0 + $0x2] sm:$0x3]  ;;  %v10_v2 = vld [vmem:[%s278_s0 + $0x4] sm:$0x3]  ;;  %v70_v4 = vunpack.c.l.s4 %v227_v3  ;;  %v79_v10 = vunpack.c.l.s4 %v228_v9 }
   0x2   :  { %v11_v5 = vld [vmem:[%s278_s0 + $0x6] sm:$0x3]  ;;  %v12_v6 = vld [vmem:[%s278_s0 + $0x8] sm:$0x3]  ;;  %v13_v7 = vld [vmem:[%s278_s0 + $0xa] sm:$0x3] }
   0x3   :  { %v15_v11 = vsel %vm14_vm0, %v8_v0, 0.0  ;;  %v22_v12 = vsel %vm14_vm0, %v9_v1, 0.0  ;;  %v29_v13 = vsel %vm14_vm0, %v10_v2, 0.0  ;;  %v36_v14 = vsel %vm14_vm0, %v11_v5, 0.0  ;;  %s230_s0 = smov 4  }
   0x4   :  { %v16_v15 = vrot.slane %v15_v11, 4  ;;  %v23_v16 = vrot.slane %v22_v12, 4  ;;  %v30_v17 = vrot.slane %v29_v13, 4  ;;  %v37_v18 = vrot.slane %v36_v14, 4 }
   0x5   :  { %v43_v19 = vsel %vm14_vm0, %v12_v6, 0.0  ;;  %v50_v20 = vsel %vm14_vm0, %v13_v7, 0.0  ;;  %v63_v21 = vadd.f32 %v36_v14, %v15_v11  ;;  %v71_v22 = vunpack.c.0.s8 %v70_v4 }
   0x6   :  { %v17_v23 = vadd.f32 %v16_v15, %v15_v11  ;;  %v24_v24 = vadd.f32 %v23_v16, %v22_v12  ;;  %v31_v25 = vadd.f32 %v30_v17, %v29_v13  ;;  %v38_v26 = vadd.f32 %v37_v18, %v36_v14 }
   0x7   :  { %v44_v27 = vrot.slane %v43_v19, 4  ;;  %v51_v28 = vrot.slane %v50_v20, 4  ;;  %v64_v29 = vadd.f32 %v43_v19, %v22_v12  ;;  %v65_v30 = vadd.f32 %v50_v20, %v29_v13 }
   0x8   :  { %v18_v31 = vrot.slane %v17_v23, 2  ;;  %v25_v32 = vrot.slane %v24_v24, 2  ;;  %v32_v33 = vrot.slane %v31_v25, 2  ;;  %v39_v34 = vrot.slane %v38_v26, 2 }
   0x9   :  { %v45_v35 = vadd.f32 %v44_v27, %v43_v19  ;;  %v52_v36 = vadd.f32 %v51_v28, %v50_v20  ;;  %v66_v37 = vmul.f32 2.0, %v63_v21  ;;  %v67_v38 = vmul.f32 2.0, %v65_v30 }
   0xa   :  { %v19_v39 = vadd.f32 %v18_v31, %v17_v23  ;;  %v26_v40 = vadd.f32 %v25_v32, %v24_v24  ;;  %v33_v41 = vadd.f32 %v32_v33, %v31_v25  ;;  %v40_v42 = vadd.f32 %v39_v34, %v38_v26 }
   0xb   :  { %v46_v43 = vrot.slane %v45_v35, 2  ;;  %v53_v44 = vrot.slane %v52_v36, 2  ;;  %v68_v45 = vcombine.low %v66_v37, %v67_v38  ;;  %v73_v46 = vshrl.u32 %v72_v8, 7 }
   0xc   :  { %v20_v47 = vrot.slane %v19_v39, 1  ;;  %v27_v48 = vrot.slane %v26_v40, 1  ;;  %v34_v49 = vrot.slane %v33_v41, 1  ;;  %v41_v50 = vrot.slane %v40_v42, 1 }
   0xd   :  { %v47_v51 = vadd.f32 %v46_v43, %v45_v35  ;;  %v54_v52 = vadd.f32 %v53_v44, %v52_v36  ;;  %v74_v53 = vsub.s32 %v71_v22, %v73_v46  ;;  %v76_v54 = vmul.f32 2.0, %v64_v29 }
   0xe   :  { %v21_v55 = vadd.f32 %v20_v47, %v19_v39  ;;  %v28_v56 = vadd.f32 %v27_v48, %v26_v40  ;;  %v35_v57 = vadd.f32 %v34_v49, %v33_v41  ;;  %v42_v58 = vadd.f32 %v41_v50, %v40_v42 }
   0xf   :  { %v48_v59 = vrot.slane %v47_v51, 1  ;;  %v55_v60 = vrot.slane %v54_v52, 1  ;;  %v75_v61 = vrot.slane %v68_v45, %v74_v53  ;;  %v80_v62 = vunpack.c.0.s8 %v79_v10 }
  0x10   :  { %v57_v63 = vmul.f32 2.0, %v21_v55  ;;  %v58_v0 = vmul.f32 2.0, %v28_v56  ;;  %v59_v1 = vmul.f32 2.0, %v35_v57  ;;  %v60_v2 = vmul.f32 2.0, %v42_v58 }
  0x11   :  { %v49_v3 = vadd.f32 %v48_v59, %v47_v51  ;;  %v56_v4 = vadd.f32 %v55_v60, %v54_v52  ;;  %v77_v5 = vcombine.low %v75_v61, %v76_v54  ;;  %v83_v6 = vsub.s32 %v80_v62, %v73_v46 }
  0x12   :  { %v98_v7 = vrot.slane %v58_v0, 7  ;;  %vm99_vm1 = vcmask 1041409   ;;  %v101_v8 = vrot.slane %v59_v1, 6  ;;  %vm102_vm2 = vcmask 1042434  }
  0x13   :  { %v61_v9 = vmul.f32 2.0, %v49_v3  ;;  %v62_v11 = vmul.f32 2.0, %v56_v4  ;;  %v84_v12 = vrot.slane %v77_v5, %v83_v6  ;;  %v229_v14 = vmov 0.0  }
  0x14   :  { %v100_v13 = vsel %vm99_vm1, %v98_v7, %v57_v63  ;;  %vm200_vm3 = vcmask 15360   ;;  %vm203_vm4 = vcmask 31744   ;;  %vm206_vm5 = vcmask 43008  }
  0x15   :  { %v85_v15 = vcombine.high %v84_v12, %v229_v14  ;;  %v103_v16 = vsel %vm102_vm2, %v101_v8, %v100_v13  ;;  %v108_v10 = vrot.slane %v61_v9, 7  ;;  %v110_v17 = vrot.slane %v62_v11, 6 }
  0x16   :  { %v120_v18 = vcombine.low %v103_v16, %v84_v12  ;;  %v134_v19 = vrot.slane %v84_v12, %v74_v53 }
  0x17   :  { %v109_v20 = vsel %vm99_vm1, %v108_v10, %v60_v2  ;;  %v166_v24 = vrot.slane %v85_v15, %v74_v53 }
  0x18   :  { %v111_v21 = vsel %vm102_vm2, %v110_v17, %v109_v20  ;;  %v127_v22 = vrot.slane %v120_v18, %v74_v53 }
  0x19   :  { %v152_v23 = vcombine.low %v111_v21, %v85_v15 }
  0x1a   :  { %v135_v25 = vcombine.low %v127_v22, %v134_v19  ;;  %v136_v26 = vcombine.high %v127_v22, %v134_v19 }
  0x1b   :  { %v159_v27 = vrot.slane %v152_v23, %v74_v53 }
  0x1c   :  { %v143_v28 = vrot.slane %v135_v25, %v83_v6  ;;  %v151_v29 = vrot.slane %v136_v26, %v83_v6 }
  0x1d   :  { %v167_v30 = vcombine.low %v159_v27, %v166_v24  ;;  %v168_v31 = vcombine.high %v159_v27, %v166_v24 }
  0x1e   :  { %v144_v32 = vcombine.high %v143_v28, %v229_v14  ;;  %194 = vrot.lane.b32.xlu1 %v151_v29, %s230_s0 }
  0x1f   :  { %v175_v33 = vrot.slane %v167_v30, %v83_v6  ;;  %v183_v34 = vrot.slane %v168_v31, %v83_v6 }
  0x20   :  { %186 = vrot.lane.b32.xlu0 %v144_v32, %s231_s18 }
  0x21   :  { %v176_v35 = vcombine.high %v175_v33, %v229_v14 }
  0x22   :  { %196 = vrot.lane.b32.xlu1 %v183_v34, %s230_s0 }
  0x24   :  { %188 = vrot.lane.b32.xlu0 %v176_v35, %s231_s18 }
  0x90   :  { %v195_v36 = vpop.permute.xlu1 %194 }
  0x92   :  { %v187_v37 = vpop.permute.xlu0 %186 }
  0x93   :  { %v201_v38 = vsel %vm200_vm3, %v143_v28, %v187_v37 }
  0x94   :  { %v204_v39 = vsel %vm203_vm4, %v201_v38, %v195_v36  ;;  %v197_v40 = vpop.permute.xlu1 %196 }
  0x95   :  { %207 = vst.msk [vmem:[%s279_s1] sm:$0x7] %vm206_vm5, %v204_v39  ;;  %220 = vst.msk [vmem:[%s279_s1 + $0x8] sm:$0x7] %vm206_vm5, %v204_v39 }
  0x96   :  { %v189_v41 = vpop.permute.xlu0 %188 }
  0x97   :  { %v202_v42 = vsel %vm200_vm3, %v175_v33, %v189_v41 }
  0x98   :  { %v205_v43 = vsel %vm203_vm4, %v202_v42, %v197_v40 }
  0x99   :  { %208 = vst.msk [vmem:[%s279_s1 + $0x4] sm:$0x7] %vm206_vm5, %v205_v43  ;;  %221 = vst.msk [vmem:[%s279_s1 + $0xc] sm:$0x7] %vm206_vm5, %v205_v43 }

// kernel: tpu_custom_call.1
= control target key start
LH: loop header
LB: loop body
LE: loop exit
PB: predicated region body
PF: predicated region fallthrough
CT: control target
= control target key end

     0   :  { %vm14_vm0 = vcmask 9216   ;;  %v208_v6 = vmov 1983009808   ;;  %vm82_vm1 = vcmask 1041409   ;;  %v107_v19 = vlaneseq  ;;  %s212_s18 = smov 2   ;;  %s270_s0 = inlined_call_operand.vmem [shape: f32[2,3,2,2], index: 0, kind: input, shape index: {}]   ;;  %s271_s1 = inlined_call_operand.vmem [shape: f32[2,2,3,6], index: 1, kind: output, shape index: {}]  }
   0x1   :  { %v8_v0 = vld [vmem:[%s270_s0] sm:$0x3]  ;;  %v9_v1 = vld [vmem:[%s270_s0 + $0x2] sm:$0x3]  ;;  %v10_v2 = vld [vmem:[%s270_s0 + $0x4] sm:$0x3]  ;;  %v241_v7 = vunpack.c.l.s4 %v208_v6 }
   0x2   :  { %v11_v3 = vld [vmem:[%s270_s0 + $0x6] sm:$0x3]  ;;  %v12_v4 = vld [vmem:[%s270_s0 + $0x8] sm:$0x3]  ;;  %v13_v5 = vld [vmem:[%s270_s0 + $0xa] sm:$0x3] }
   0x3   :  { %v15_v8 = vsel %vm14_vm0, %v8_v0, 0.0  ;;  %v22_v9 = vsel %vm14_vm0, %v9_v1, 0.0  ;;  %v29_v10 = vsel %vm14_vm0, %v10_v2, 0.0  ;;  %v36_v11 = vsel %vm14_vm0, %v11_v3, 0.0  ;;  %s211_s0 = smov 4  }
   0x4   :  { %v16_v12 = vrot.slane %v15_v8, 4  ;;  %v23_v13 = vrot.slane %v22_v9, 4  ;;  %v30_v14 = vrot.slane %v29_v10, 4  ;;  %v37_v15 = vrot.slane %v36_v11, 4 }
   0x5   :  { %v43_v16 = vsel %vm14_vm0, %v12_v4, 0.0  ;;  %v50_v17 = vsel %vm14_vm0, %v13_v5, 0.0  ;;  %v63_v18 = vadd.f32 %v36_v11, %v15_v8  ;;  %vm85_vm2 = vcmask 1042434  }
   0x6   :  { %v17_v20 = vadd.f32 %v16_v12, %v15_v8  ;;  %v24_v21 = vadd.f32 %v23_v13, %v22_v9  ;;  %v31_v22 = vadd.f32 %v30_v14, %v29_v10  ;;  %v38_v23 = vadd.f32 %v37_v15, %v36_v11 }
   0x7   :  { %v44_v24 = vrot.slane %v43_v16, 4  ;;  %v51_v25 = vrot.slane %v50_v17, 4  ;;  %v64_v26 = vadd.f32 %v43_v16, %v22_v9  ;;  %v65_v27 = vadd.f32 %v50_v17, %v29_v10 }
   0x8   :  { %v18_v28 = vrot.slane %v17_v20, 2  ;;  %v25_v29 = vrot.slane %v24_v21, 2  ;;  %v32_v30 = vrot.slane %v31_v22, 2  ;;  %v39_v31 = vrot.slane %v38_v23, 2 }
   0x9   :  { %v45_v32 = vadd.f32 %v44_v24, %v43_v16  ;;  %v52_v33 = vadd.f32 %v51_v25, %v50_v17  ;;  %v66_v34 = vmul.f32 2.0, %v63_v18  ;;  %v67_v35 = vmul.f32 2.0, %v64_v26 }
   0xa   :  { %v19_v36 = vadd.f32 %v18_v28, %v17_v20  ;;  %v26_v37 = vadd.f32 %v25_v29, %v24_v21  ;;  %v33_v38 = vadd.f32 %v32_v30, %v31_v22  ;;  %v40_v39 = vadd.f32 %v39_v31, %v38_v23 }
   0xb   :  { %v46_v40 = vrot.slane %v45_v32, 2  ;;  %v53_v41 = vrot.slane %v52_v33, 2  ;;  %v68_v42 = vmul.f32 2.0, %v65_v27  ;;  %v72_v43 = vrot.slane %v66_v34, 1 }
   0xc   :  { %v20_v44 = vrot.slane %v19_v36, 1  ;;  %v27_v45 = vrot.slane %v26_v37, 1  ;;  %v34_v46 = vrot.slane %v33_v38, 1  ;;  %v41_v47 = vrot.slane %v40_v39, 1 }
   0xd   :  { %v47_v48 = vadd.f32 %v46_v40, %v45_v32  ;;  %v54_v49 = vadd.f32 %v53_v41, %v52_v33  ;;  %v87_v50 = vrot.slane %v67_v35, 7  ;;  %v106_v51 = vunpack.c.0.s8 %v241_v7 }
   0xe   :  { %v21_v52 = vadd.f32 %v20_v44, %v19_v36  ;;  %v28_v53 = vadd.f32 %v27_v45, %v26_v37  ;;  %v35_v54 = vadd.f32 %v34_v46, %v33_v38  ;;  %v42_v55 = vadd.f32 %v41_v47, %v40_v39 }
   0xf   :  { %v48_v56 = vrot.slane %v47_v48, 1  ;;  %v55_v57 = vrot.slane %v54_v49, 1  ;;  %v88_v58 = vsel %vm82_vm1, %v87_v50, %v66_v34  ;;  %v89_v59 = vrot.slane %v68_v42, 6 }
  0x10   :  { %v57_v60 = vmul.f32 2.0, %v21_v52  ;;  %v58_v61 = vmul.f32 2.0, %v28_v53  ;;  %v59_v62 = vmul.f32 2.0, %v35_v54  ;;  %v96_v63 = vsel %vm82_vm1, %v67_v35, %v72_v43 }
  0x11   :  { %v49_v0 = vadd.f32 %v48_v56, %v47_v48  ;;  %v56_v1 = vadd.f32 %v55_v57, %v54_v49  ;;  %v60_v2 = vmul.f32 2.0, %v42_v55  ;;  %v200_v3 = vrot.slane %v68_v42, 7 }
  0x12   :  { %v81_v4 = vrot.slane %v58_v61, 7  ;;  %v84_v5 = vrot.slane %v59_v62, 6  ;;  %v108_v6 = vshrl.u32 %v107_v19, 7  ;;  %v90_v9 = vsel %vm85_vm2, %v89_v59, %v88_v58 }
  0x13   :  { %v61_v7 = vmul.f32 2.0, %v49_v0  ;;  %v62_v8 = vmul.f32 2.0, %v56_v1  ;;  %v209_v10 = vmov 1934713408   ;;  %v98_v18 = vsel %vm85_vm2, %v200_v3, %v96_v63 }
  0x14   :  { %v121_v11 = vunpack.c.l.s4 %v209_v10  ;;  %v83_v12 = vsel %vm82_vm1, %v81_v4, %v57_v60  ;;  %v109_v13 = vsub.s32 %v106_v51, %v108_v6  ;;  %v210_v34 = vmov 0.0  }
  0x15   :  { %v86_v14 = vsel %vm85_vm2, %v84_v5, %v83_v12  ;;  %v91_v15 = vrot.slane %v61_v7, 7  ;;  %v93_v16 = vrot.slane %v62_v8, 6  ;;  %vm183_vm3 = vcmask 15360  }
  0x16   :  { %v122_v17 = vunpack.c.0.s8 %v121_v11  ;;  %v103_v20 = vcombine.low %v86_v14, %v90_v9  ;;  %v117_v21 = vrot.slane %v90_v9, %v109_v13  ;;  %v149_v26 = vrot.slane %v98_v18, %v109_v13 }
  0x17   :  { %v92_v19 = vsel %vm82_vm1, %v91_v15, %v60_v2  ;;  %vm186_vm4 = vcmask 31744   ;;  %vm189_vm5 = vcmask 43008  }
  0x18   :  { %v94_v22 = vsel %vm85_vm2, %v93_v16, %v92_v19  ;;  %v110_v23 = vrot.slane %v103_v20, %v109_v13  ;;  %v125_v24 = vsub.s32 %v122_v17, %v108_v6 }
  0x19   :  { %v135_v25 = vcombine.low %v94_v22, %v98_v18 }
  0x1a   :  { %v118_v27 = vcombine.low %v110_v23, %v117_v21  ;;  %v119_v28 = vcombine.high %v110_v23, %v117_v21 }
  0x1b   :  { %v142_v29 = vrot.slane %v135_v25, %v109_v13 }
  0x1c   :  { %v126_v30 = vrot.slane %v118_v27, %v125_v24  ;;  %v134_v31 = vrot.slane %v119_v28, %v125_v24 }
  0x1d   :  { %v150_v32 = vcombine.low %v142_v29, %v149_v26  ;;  %v151_v33 = vcombine.high %v142_v29, %v149_v26 }
  0x1e   :  { %v127_v35 = vcombine.high %v126_v30, %v210_v34  ;;  %177 = vrot.lane.b32.xlu1 %v134_v31, %s211_s0 }
  0x1f   :  { %v158_v36 = vrot.slane %v150_v32, %v125_v24  ;;  %v166_v37 = vrot.slane %v151_v33, %v125_v24 }
  0x20   :  { %169 = vrot.lane.b32.xlu0 %v127_v35, %s212_s18 }
  0x21   :  { %v159_v38 = vcombine.high %v158_v36, %v210_v34 }
  0x22   :  { %179 = vrot.lane.b32.xlu1 %v166_v37, %s211_s0 }
  0x24   :  { %171 = vrot.lane.b32.xlu0 %v159_v38, %s212_s18 }
  0x90   :  { %v178_v39 = vpop.permute.xlu1 %177 }
  0x92   :  { %v170_v40 = vpop.permute.xlu0 %169 }
  0x93   :  { %v184_v41 = vsel %vm183_vm3, %v126_v30, %v170_v40 }
  0x94   :  { %v187_v42 = vsel %vm186_vm4, %v184_v41, %v178_v39  ;;  %v180_v43 = vpop.permute.xlu1 %179 }
  0x95   :  { %190 = vst.msk [vmem:[%s271_s1] sm:$0x7] %vm189_vm5, %v187_v42  ;;  %201 = vst.msk [vmem:[%s271_s1 + $0x8] sm:$0x7] %vm189_vm5, %v187_v42 }
  0x96   :  { %v172_v44 = vpop.permute.xlu0 %171 }
  0x97   :  { %v185_v45 = vsel %vm183_vm3, %v158_v36, %v172_v44 }
  0x98   :  { %v188_v46 = vsel %vm186_vm4, %v185_v45, %v180_v43 }
  0x99   :  { %191 = vst.msk [vmem:[%s271_s1 + $0x4] sm:$0x7] %vm189_vm5, %v188_v46  ;;  %202 = vst.msk [vmem:[%s271_s1 + $0xc] sm:$0x7] %vm189_vm5, %v188_v46 }

</bundles_post_ra>
